<compile_context>
chip_gen: v7x
topology: tpu7x:2x2x1
jax: 0.10.0
libtpu: 0.0.40
codegen_flags: <defaults>
</compile_context>

<pallas_src>
import jax
import jax.numpy as jnp
from jax.experimental import pallas as pl
from jax.experimental.pallas import tpu as pltpu

LANE = 128
SUBLANE = 8
OUT_PAD = 8  # final logit column padded to 8 lanes (narrow, cheap writeback)


def _round_up(n, m):
    return ((n + m - 1) // m) * m


def _leaky_relu(h, slope=0.2):
    # For slope < 1, max(h, slope*h) == LeakyReLU(slope): 2 VPU ops vs 3.
    return jnp.maximum(h, slope * h)


def disc_kernel(x_ref, w1_ref, b1_ref, w2_ref, b2_ref, w3_ref, b3_ref,
                w4_ref, b4_ref, out_ref):
    # x arrives straight from HBM (f32); cast to bf16 in-register so there is
    # no extra wrapper-side HBM pass over x.
    x = x_ref[...].astype(jnp.bfloat16)
    # Layer 1: im_dim -> 4*hidden (lane-padded), LeakyReLU(0.2)
    h = jnp.dot(x, w1_ref[...], preferred_element_type=jnp.float32)
    h = _leaky_relu(h + b1_ref[...])
    # Layer 2: 4*hidden -> 2*hidden (lane-padded), LeakyReLU(0.2)
    h = jnp.dot(h.astype(jnp.bfloat16), w2_ref[...],
                preferred_element_type=jnp.float32)
    h = _leaky_relu(h + b2_ref[...])
    # Layer 3: 2*hidden -> hidden (lane-padded), LeakyReLU(0.2)
    h = jnp.dot(h.astype(jnp.bfloat16), w3_ref[...],
                preferred_element_type=jnp.float32)
    h = _leaky_relu(h + b3_ref[...])
    # Layer 4: hidden -> 1 (padded to 8 lanes), no activation
    h = jnp.dot(h.astype(jnp.bfloat16), w4_ref[...],
                preferred_element_type=jnp.float32) + b4_ref[...]
    out_ref[...] = h.astype(out_ref.dtype)


def prepare_params(params):
    """One-time param prep (outside the forward path).

    Layer-1 input dim stays unpadded (x is fed straight in); later layers'
    input dims and all hidden output dims are zero-padded to multiples of 128
    lanes; the final output dim is padded only to 8 lanes. Weights are cast to
    bf16 (MXU input width), biases stay f32. Zero padding is mathematically
    inert (LeakyReLU(0) = 0 propagates zeros through padded columns)."""
    prepped = []
    for i in range(1, 5):
        w = params[f"w{i}"]
        b = params[f"b{i}"]
        din, dout = w.shape
        pin = din if i == 1 else _round_up(din, LANE)
        pout = OUT_PAD if i == 4 else _round_up(dout, LANE)
        wp = jnp.zeros((pin, pout), jnp.float32).at[:din, :dout].set(w)
        bp = jnp.zeros((1, pout), jnp.float32).at[:, :dout].set(b)
        prepped.append((wp.astype(jnp.bfloat16), bp))
    return tuple(prepped)


def discriminator_forward(x, prepped, *, tb=None):
    """x: (B, im_dim) float32. prepped: output of prepare_params. -> (B, 1)."""
    B, im_dim = x.shape
    (w1, b1), (w2, b2), (w3, b3), (w4, b4) = prepped
    assert w1.shape[0] == im_dim, (w1.shape, im_dim)

    if tb is None:
        # Large tiles amortize the ~0.35 us/step fixed overhead; clamp so the
        # grid keeps >= 2 steps when the batch allows it (both TCs on v7x).
        tb = min(512, _round_up(max(B // 2, SUBLANE), SUBLANE))
    grid = (pl.cdiv(B, tb),)

    # Weights/biases: constant index_map -> fetched once, resident in VMEM.
    const = lambda a: pl.BlockSpec(a.shape, lambda i: (0, 0))

    d1, d2, d3, d4 = w1.shape[1], w2.shape[1], w3.shape[1], w4.shape[1]
    flops = 2 * B * (im_dim * d1 + d1 * d2 + d2 * d3 + d3 * d4)
    w_bytes = sum(int(a.size) * a.dtype.itemsize
                  for pair in prepped for a in pair)
    cost = pl.CostEstimate(
        flops=flops,
        transcendentals=0,
        bytes_accessed=int(x.size) * x.dtype.itemsize + B * d4 * 4 + w_bytes)

    out = pl.pallas_call(
        disc_kernel,
        out_shape=jax.ShapeDtypeStruct((B, OUT_PAD), jnp.float32),
        grid=grid,
        in_specs=[
            pl.BlockSpec((tb, im_dim), lambda i: (i, 0)),  # x tile (pipelined)
            const(w1), const(b1),
            const(w2), const(b2),
            const(w3), const(b3),
            const(w4), const(b4),
        ],
        out_specs=pl.BlockSpec((tb, OUT_PAD), lambda i: (i, 0)),
        compiler_params=pltpu.CompilerParams(
            dimension_semantics=("parallel",),      # shards grid on v7x 2 TCs
            vmem_limit_bytes=32 * 1024 * 1024,      # covers v5e's 16 MiB default
        ),
        cost_estimate=cost,
    )(x, w1, b1, w2, b2, w3, b3, w4, b4)
    return out[:, :1]


def init_params(key, im_dim, hidden_dim):
    """Deterministic PyTorch-style (uniform +-1/sqrt(fan_in)) init, stored as
    (in_features, out_features) so y = x @ W + b."""
    dims = [(im_dim, hidden_dim * 4),
            (hidden_dim * 4, hidden_dim * 2),
            (hidden_dim * 2, hidden_dim),
            (hidden_dim, 1)]
    params = {}
    for i, (din, dout) in enumerate(dims, start=1):
        key, kw, kb = jax.random.split(key, 3)
        bound = 1.0 / (din ** 0.5)
        params[f"w{i}"] = jax.random.uniform(kw, (din, dout), jnp.float32,
                                             -bound, bound)
        params[f"b{i}"] = jax.random.uniform(kb, (dout,), jnp.float32,
                                             -bound, bound)
    return params


def reference_forward_prepped(x, prepped):
    """Pure-JAX mirror of the kernel math (same bf16 operands, f32 accum)."""
    def leaky(h):
        return jnp.maximum(h, 0.2 * h)
    (w1, b1), (w2, b2), (w3, b3), (w4, b4) = prepped
    h = leaky(jnp.dot(x.astype(jnp.bfloat16), w1,
                      preferred_element_type=jnp.float32) + b1)
    h = leaky(jnp.dot(h.astype(jnp.bfloat16), w2,
                      preferred_element_type=jnp.float32) + b2)
    h = leaky(jnp.dot(h.astype(jnp.bfloat16), w3,
                      preferred_element_type=jnp.float32) + b3)
    h = jnp.dot(h.astype(jnp.bfloat16), w4,
                preferred_element_type=jnp.float32) + b4
    return h[:, :1]


def reference_forward_f32(x, p):
    """Full-f32 reference matching the original nn.Module semantics."""
    def leaky(h):
        return jnp.where(h >= 0, h, 0.2 * h)
    h = leaky(x @ p["w1"] + p["b1"])
    h = leaky(h @ p["w2"] + p["b2"])
    h = leaky(h @ p["w3"] + p["b3"])
    return h @ p["w4"] + p["b4"]


if __name__ == "__main__":
    # Small shapes consistent with the module (im_dim, hidden_dim are ctor args).
    B, IM_DIM, HIDDEN = 8, 128, 32
    key = jax.random.PRNGKey(0)
    key, kx = jax.random.split(key)
    x = jax.random.normal(kx, (B, IM_DIM), jnp.float32)
    params = init_params(key, IM_DIM, HIDDEN)
    prepped = prepare_params(params)   # padding/bf16 cast hoisted out of fwd

    out = jax.block_until_ready(discriminator_forward(x, prepped))
    assert out.shape == (B, 1), out.shape

    # Tight check against a pure-JAX mirror of the same bf16/f32 math.
    ref = reference_forward_prepped(x, prepped)
    assert jnp.allclose(out, ref, atol=1e-3, rtol=1e-3), (
        float(jnp.max(jnp.abs(out - ref))))

    # Loose sanity check against the full-f32 module semantics
    # (bf16 MXU feeds are an intentional accuracy/perf trade-off).
    ref32 = reference_forward_f32(x, params)
    assert jnp.allclose(out, ref32, atol=0.15, rtol=0.15), (
        float(jnp.max(jnp.abs(out - ref32))))

    # Exercise the non-multiple-of-tile batch path (partial last grid block).
    key, kx2 = jax.random.split(key)
    x2 = jax.random.normal(kx2, (20, IM_DIM), jnp.float32)
    out2 = jax.block_until_ready(discriminator_forward(x2, prepped))
    ref2 = reference_forward_prepped(x2, prepped)
    assert out2.shape == (20, 1), out2.shape
    assert jnp.allclose(out2, ref2, atol=1e-3, rtol=1e-3), (
        float(jnp.max(jnp.abs(out2 - ref2))))

    print("KERNEL_OK")
</pallas_src>

<mosaic_0001>
module attributes {stable_mosaic.version = 11 : i64} {
  func.func @disc_kernel(%arg0: i32, %arg1: memref<8x128xf32, #tpu.memory_space<vmem>>, %arg2: memref<128x128xbf16, #tpu.memory_space<vmem>>, %arg3: memref<1x128xf32, #tpu.memory_space<vmem>>, %arg4: memref<128x128xbf16, #tpu.memory_space<vmem>>, %arg5: memref<1x128xf32, #tpu.memory_space<vmem>>, %arg6: memref<128x128xbf16, #tpu.memory_space<vmem>>, %arg7: memref<1x128xf32, #tpu.memory_space<vmem>>, %arg8: memref<128x8xbf16, #tpu.memory_space<vmem>>, %arg9: memref<1x8xf32, #tpu.memory_space<vmem>>, %arg10: memref<8x8xf32, #tpu.memory_space<vmem>>) attributes {dimension_semantics = [#tpu.dimension_semantics<parallel>], iteration_bounds = array<i64: 1>, scalar_prefetch = 0 : i64, scratch_operands = 0 : i64, tpu.core_type = #tpu.core_type<tc>, window_params = [{transform_indices = @transform_0, window_bounds = array<i64: 8, 128>}, {pipeline_mode = #tpu.pipeline_mode<synchronous>, transform_indices = @transform_1, window_bounds = array<i64: 128, 128>}, {pipeline_mode = #tpu.pipeline_mode<synchronous>, transform_indices = @transform_2, window_bounds = array<i64: 1, 128>}, {pipeline_mode = #tpu.pipeline_mode<synchronous>, transform_indices = @transform_3, window_bounds = array<i64: 128, 128>}, {pipeline_mode = #tpu.pipeline_mode<synchronous>, transform_indices = @transform_4, window_bounds = array<i64: 1, 128>}, {pipeline_mode = #tpu.pipeline_mode<synchronous>, transform_indices = @transform_5, window_bounds = array<i64: 128, 128>}, {pipeline_mode = #tpu.pipeline_mode<synchronous>, transform_indices = @transform_6, window_bounds = array<i64: 1, 128>}, {pipeline_mode = #tpu.pipeline_mode<synchronous>, transform_indices = @transform_7, window_bounds = array<i64: 128, 8>}, {pipeline_mode = #tpu.pipeline_mode<synchronous>, transform_indices = @transform_8, window_bounds = array<i64: 1, 8>}, {transform_indices = @transform_9, window_bounds = array<i64: 8, 8>}]} {
    %c0 = arith.constant 0 : index
    %c0_0 = arith.constant 0 : index
    %0 = vector.load %arg1[%c0, %c0_0] : memref<8x128xf32, #tpu.memory_space<vmem>>, vector<8x128xf32>
    %1 = arith.truncf %0 : vector<8x128xf32> to vector<8x128xbf16>
    %c0_1 = arith.constant 0 : index
    %c0_2 = arith.constant 0 : index
    %2 = vector.load %arg2[%c0_1, %c0_2] : memref<128x128xbf16, #tpu.memory_space<vmem>>, vector<128x128xbf16>
    %cst = arith.constant dense<0.000000e+00> : vector<8x128xf32>
    %3 = tpu.matmul %1, %2, %cst {dimension_numbers = #tpu.dot_dimension_numbers<[1], [0], [0], [1], [0, 0, 1, 1], [], []>} : vector<8x128xbf16>, vector<128x128xbf16>, vector<8x128xf32> -> vector<8x128xf32>
    %c0_3 = arith.constant 0 : index
    %c0_4 = arith.constant 0 : index
    %4 = vector.load %arg3[%c0_3, %c0_4] : memref<1x128xf32, #tpu.memory_space<vmem>>, vector<1x128xf32>
    %5 = vector.broadcast %4 : vector<1x128xf32> to vector<8x128xf32>
    %6 = arith.addf %3, %5 : vector<8x128xf32>
    %cst_5 = arith.constant 2.000000e-01 : f32
    %7 = vector.broadcast %cst_5 : f32 to vector<8x128xf32>
    %8 = arith.mulf %7, %6 : vector<8x128xf32>
    %9 = arith.maximumf %6, %8 : vector<8x128xf32>
    %10 = arith.truncf %9 : vector<8x128xf32> to vector<8x128xbf16>
    %c0_6 = arith.constant 0 : index
    %c0_7 = arith.constant 0 : index
    %11 = vector.load %arg4[%c0_6, %c0_7] : memref<128x128xbf16, #tpu.memory_space<vmem>>, vector<128x128xbf16>
    %cst_8 = arith.constant dense<0.000000e+00> : vector<8x128xf32>
    %12 = tpu.matmul %10, %11, %cst_8 {dimension_numbers = #tpu.dot_dimension_numbers<[1], [0], [0], [1], [0, 0, 1, 1], [], []>} : vector<8x128xbf16>, vector<128x128xbf16>, vector<8x128xf32> -> vector<8x128xf32>
    %c0_9 = arith.constant 0 : index
    %c0_10 = arith.constant 0 : index
    %13 = vector.load %arg5[%c0_9, %c0_10] : memref<1x128xf32, #tpu.memory_space<vmem>>, vector<1x128xf32>
    %14 = vector.broadcast %13 : vector<1x128xf32> to vector<8x128xf32>
    %15 = arith.addf %12, %14 : vector<8x128xf32>
    %cst_11 = arith.constant 2.000000e-01 : f32
    %16 = vector.broadcast %cst_11 : f32 to vector<8x128xf32>
    %17 = arith.mulf %16, %15 : vector<8x128xf32>
    %18 = arith.maximumf %15, %17 : vector<8x128xf32>
    %19 = arith.truncf %18 : vector<8x128xf32> to vector<8x128xbf16>
    %c0_12 = arith.constant 0 : index
    %c0_13 = arith.constant 0 : index
    %20 = vector.load %arg6[%c0_12, %c0_13] : memref<128x128xbf16, #tpu.memory_space<vmem>>, vector<128x128xbf16>
    %cst_14 = arith.constant dense<0.000000e+00> : vector<8x128xf32>
    %21 = tpu.matmul %19, %20, %cst_14 {dimension_numbers = #tpu.dot_dimension_numbers<[1], [0], [0], [1], [0, 0, 1, 1], [], []>} : vector<8x128xbf16>, vector<128x128xbf16>, vector<8x128xf32> -> vector<8x128xf32>
    %c0_15 = arith.constant 0 : index
    %c0_16 = arith.constant 0 : index
    %22 = vector.load %arg7[%c0_15, %c0_16] : memref<1x128xf32, #tpu.memory_space<vmem>>, vector<1x128xf32>
    %23 = vector.broadcast %22 : vector<1x128xf32> to vector<8x128xf32>
    %24 = arith.addf %21, %23 : vector<8x128xf32>
    %cst_17 = arith.constant 2.000000e-01 : f32
    %25 = vector.broadcast %cst_17 : f32 to vector<8x128xf32>
    %26 = arith.mulf %25, %24 : vector<8x128xf32>
    %27 = arith.maximumf %24, %26 : vector<8x128xf32>
    %28 = arith.truncf %27 : vector<8x128xf32> to vector<8x128xbf16>
    %c0_18 = arith.constant 0 : index
    %c0_19 = arith.constant 0 : index
    %29 = vector.load %arg8[%c0_18, %c0_19] : memref<128x8xbf16, #tpu.memory_space<vmem>>, vector<128x8xbf16>
    %cst_20 = arith.constant dense<0.000000e+00> : vector<8x8xf32>
    %30 = tpu.matmul %28, %29, %cst_20 {dimension_numbers = #tpu.dot_dimension_numbers<[1], [0], [0], [1], [0, 0, 1, 1], [], []>} : vector<8x128xbf16>, vector<128x8xbf16>, vector<8x8xf32> -> vector<8x8xf32>
    %c0_21 = arith.constant 0 : index
    %c0_22 = arith.constant 0 : index
    %31 = vector.load %arg9[%c0_21, %c0_22] : memref<1x8xf32, #tpu.memory_space<vmem>>, vector<1x8xf32>
    %32 = vector.broadcast %31 : vector<1x8xf32> to vector<8x8xf32>
    %33 = arith.addf %30, %32 : vector<8x8xf32>
    %c0_23 = arith.constant 0 : index
    %c0_24 = arith.constant 0 : index
    %34 = vector.load %arg10[%c0_23, %c0_24] : memref<8x8xf32, #tpu.memory_space<vmem>>, vector<8x8xf32>
    tpu.vector_store %arg10[%c0_23, %c0_24], %33 {strides = array<i32>} : memref<8x8xf32, #tpu.memory_space<vmem>>, vector<8x8xf32>,
    return
  }
  func.func @transform_0(%arg0: i32) -> (i32, i32) {
    %c0_i32 = arith.constant 0 : i32
    %c0_i32_0 = arith.constant 0 : i32
    return %arg0, %c0_i32 : i32, i32
  }
  func.func @transform_1(%arg0: i32) -> (i32, i32) {
    %c0_i32 = arith.constant 0 : i32
    %c0_i32_0 = arith.constant 0 : i32
    %c0_i32_1 = arith.constant 0 : i32
    return %c0_i32, %c0_i32_0 : i32, i32
  }
  func.func @transform_2(%arg0: i32) -> (i32, i32) {
    %c0_i32 = arith.constant 0 : i32
    %c0_i32_0 = arith.constant 0 : i32
    %c0_i32_1 = arith.constant 0 : i32
    return %c0_i32, %c0_i32_0 : i32, i32
  }
  func.func @transform_3(%arg0: i32) -> (i32, i32) {
    %c0_i32 = arith.constant 0 : i32
    %c0_i32_0 = arith.constant 0 : i32
    %c0_i32_1 = arith.constant 0 : i32
    return %c0_i32, %c0_i32_0 : i32, i32
  }
  func.func @transform_4(%arg0: i32) -> (i32, i32) {
    %c0_i32 = arith.constant 0 : i32
    %c0_i32_0 = arith.constant 0 : i32
    %c0_i32_1 = arith.constant 0 : i32
    return %c0_i32, %c0_i32_0 : i32, i32
  }
  func.func @transform_5(%arg0: i32) -> (i32, i32) {
    %c0_i32 = arith.constant 0 : i32
    %c0_i32_0 = arith.constant 0 : i32
    %c0_i32_1 = arith.constant 0 : i32
    return %c0_i32, %c0_i32_0 : i32, i32
  }
  func.func @transform_6(%arg0: i32) -> (i32, i32) {
    %c0_i32 = arith.constant 0 : i32
    %c0_i32_0 = arith.constant 0 : i32
    %c0_i32_1 = arith.constant 0 : i32
    return %c0_i32, %c0_i32_0 : i32, i32
  }
  func.func @transform_7(%arg0: i32) -> (i32, i32) {
    %c0_i32 = arith.constant 0 : i32
    %c0_i32_0 = arith.constant 0 : i32
    %c0_i32_1 = arith.constant 0 : i32
    return %c0_i32, %c0_i32_0 : i32, i32
  }
  func.func @transform_8(%arg0: i32) -> (i32, i32) {
    %c0_i32 = arith.constant 0 : i32
    %c0_i32_0 = arith.constant 0 : i32
    %c0_i32_1 = arith.constant 0 : i32
    return %c0_i32, %c0_i32_0 : i32, i32
  }
  func.func @transform_9(%arg0: i32) -> (i32, i32) {
    %c0_i32 = arith.constant 0 : i32
    %c0_i32_0 = arith.constant 0 : i32
    return %arg0, %c0_i32 : i32, i32
  }
}

</mosaic_0001>

<bundles_post_ra>
// kernel: tpu_custom_call.1
= control target key start
LH: loop header
LB: loop body
LE: loop exit
PB: predicated region body
PF: predicated region fallthrough
CT: control target
= control target key end

     0   :  { %14 = vsyncpa [#allocation3], 0  ;;  %s1044_s0 = inlined_call_operand.hbm [shape: f32[8,128], index: 0, kind: input, shape index: {}]   ;;  %s1045_s1 = inlined_call_operand.vmem [shape: bf16[128,128], index: 1, kind: input, shape index: {}]   ;;  %s1046_s2 = inlined_call_operand.vmem [shape: f32[1,128], index: 2, kind: input, shape index: {}]   ;;  %s1047_s3 = inlined_call_operand.hbm [shape: bf16[128,128], index: 3, kind: input, shape index: {}]   ;;  %s1048_s4 = inlined_call_operand.vmem [shape: f32[1,128], index: 4, kind: input, shape index: {}]   ;;  %s1049_s5 = inlined_call_operand.hbm [shape: bf16[128,128], index: 5, kind: input, shape index: {}]   ;;  %s1050_s6 = inlined_call_operand.vmem [shape: f32[1,128], index: 6, kind: input, shape index: {}]   ;;  %s1051_s7 = inlined_call_operand.vmem [shape: bf16[128,8], index: 7, kind: input, shape index: {}]   ;;  %s1052_s8 = inlined_call_operand.vmem [shape: f32[1,8], index: 8, kind: input, shape index: {}]   ;;  %s1053_s9 = inlined_call_operand.hbm [shape: f32[8,8], index: 9, kind: output, shape index: {}]  }
   0x1   :  { %15 = vsyncpa [#allocation6], 0 }
   0x2   :  { %16 = vsyncpa [#allocation4], 0  ;;  %s832_s30 = smov [#allocation5]   ;;  %s738_s13 = scalar_lea.hbm %s1047_s3, 1024 }
   0x3   :  { %s36_s10 = sshll.u32 %s832_s30, 4  ;;  %p739_p0 = scmp.ne.s32.totalorder %s1047_s3, %s738_s13  ;;  %s37_s10 = int_to_ptr.vmem [resolvable:$true] %s36_s10 }
   0x4   :  { %p742_p1 = scmp.lt.u32.totalorder %s738_s13, %s1047_s3 }
   0x6   :  { %p744_p2 = pnand %p742_p1, %p739_p0 }
   0x8   :  { %747 = shalt.err (!%p744_p2)
}
   0x9   :  { %s748_s18 = scalar_lea.vmem %s37_s10, 1024  ;;  %p753_p4 = scmp.lt.s32.totalorder %s37_s10, %s37_s10 }
   0xa   :  { %p749_p3 = scmp.ne.s32.totalorder %s37_s10, %s748_s18  ;;  %p754_p5 = scmp.lt.s32.totalorder %s748_s18, %s748_s18 }
   0xc   :  { %p755_p6 = por %p754_p5, %p753_p4 }
   0xe   :  { %p756_p7 = pnand %p755_p6, %p749_p3 }
  0x10   :  { %759 = shalt.err (!%p756_p7)
}
  0x11   :  { %s833_s19 = smov 64   ;;  %s834_s20 = smov 4  }
  0x12   :  { %42 = dma.hbm_to_vmem [thread:$0]  %s1047_s3, 1024, %s37_s10, [#allocation6], %s833_s19, %s833_s19, %s834_s20  }
  0x13   :  { %s835_s23 = smov [#allocation2]   ;;  %s836_s25 = smov [#allocation7]  }
  0x14   :  { %s23_s24 = sshll.u32 %s835_s23, 4  ;;  %s50_s26 = sshll.u32 %s836_s25, 4  ;;  %s24_s24 = int_to_ptr.vmem [resolvable:$true] %s23_s24  ;;  %s51_s26 = int_to_ptr.vmem [resolvable:$true] %s50_s26 }
  0x15   :  { %s760_s29 = scalar_lea.hbm %s1044_s0, 128 }
  0x16   :  { %p761_p8 = scmp.ne.s32.totalorder %s1044_s0, %s760_s29  ;;  %p764_p9 = scmp.lt.u32.totalorder %s760_s29, %s1044_s0 }
  0x18   :  { %p766_p10 = pnand %p764_p9, %p761_p8 }
  0x1a   :  { %769 = shalt.err (!%p766_p10)
}
  0x1b   :  { %s770_s3 = scalar_lea.vmem %s24_s24, 128  ;;  %p775_p12 = scmp.lt.s32.totalorder %s24_s24, %s24_s24 }
  0x1c   :  { %p771_p11 = scmp.ne.s32.totalorder %s24_s24, %s770_s3  ;;  %p776_p13 = scmp.lt.s32.totalorder %s770_s3, %s770_s3 }
  0x1e   :  { %p777_p0 = por %p776_p13, %p775_p12 }
  0x20   :  { %p778_p1 = pnand %p777_p0, %p771_p11 }
  0x22   :  { %781 = shalt.err (!%p778_p1)
}
  0x23   :  { %26 = dma.hbm_to_vmem [thread:$0]  %s1044_s0, 128, %s24_s24, [#allocation3]  }
  0x24   :  { %s782_s17 = scalar_lea.hbm %s1049_s5, 1024 }
  0x25   :  { %p783_p2 = scmp.ne.s32.totalorder %s1049_s5, %s782_s17  ;;  %p786_p3 = scmp.lt.u32.totalorder %s782_s17, %s1049_s5 }
  0x27   :  { %p788_p4 = pnand %p786_p3, %p783_p2 }
  0x29   :  { %791 = shalt.err (!%p788_p4)
}
  0x2a   :  { %s792_s25 = scalar_lea.vmem %s51_s26, 1024  ;;  %p797_p6 = scmp.lt.s32.totalorder %s51_s26, %s51_s26 }
  0x2b   :  { %p793_p5 = scmp.ne.s32.totalorder %s51_s26, %s792_s25  ;;  %p798_p7 = scmp.lt.s32.totalorder %s792_s25, %s792_s25 }
  0x2d   :  { %p799_p8 = por %p798_p7, %p797_p6 }
  0x2f   :  { %p800_p9 = pnand %p799_p8, %p793_p5 }
  0x31   :  { %803 = shalt.err (!%p800_p9)
}
  0x32   :  { %56 = dma.hbm_to_vmem [thread:$0]  %s1049_s5, 1024, %s51_s26, [#allocation6], %s833_s19, %s833_s19, %s834_s20  }
  0x33   :  { %826 = dma.done.wait [#allocation3], 128  }
  0x34   :  { %827 = vsyncadd [#allocation3], 4294967168 }
  0x35   :  { %828 = dma.done.wait [#allocation6], 2048  }
  0x36   :  { %829 = vsyncadd [#allocation6], 4294965248  ;;  %v837_v0 = vmov 0.0   ;;  %vm838_vm0 = vmmov 0   ;;  %v706_v1 = vld [vmem:[%s1045_s1] sm:$0xff]   ;;  %v707_v2 = vld [vmem:[%s1045_s1 + $0x8] sm:$0xff]  }
  0x37   :  { %618 = vmatprep.subr.bf16.mxu0 %v837_v0  ;;  %634 = vmatprep.mubr.msk.bf16.mxu0 %vm838_vm0, %v837_v0  ;;  %v708_v3 = vld [vmem:[%s1045_s1 + $0x10] sm:$0xff]   ;;  %v714_v4 = vld [vmem:[#allocation5] sm:$0xff]   ;;  %v709_v5 = vld [vmem:[%s1045_s1 + $0x18] sm:$0xff]   ;;  %s839_s14 = smov [#allocation8]   ;;  %vm528_vm1 = vcmask 64512  }
  0x38   :  { %638 = vmatprep.subr.bf16.mxu1 %v837_v0  ;;  %654 = vmatprep.mubr.msk.bf16.mxu1 %vm838_vm0, %v837_v0  ;;  %v715_v6 = vld [vmem:[#allocation5 + $0x8] sm:$0xff]   ;;  %v710_v7 = vld [vmem:[%s1045_s1 + $0x20] sm:$0xff]   ;;  %v716_v8 = vld [vmem:[#allocation5 + $0x10] sm:$0xff]  }
  0x39   :  { %619 = vmatpush3.bf16.msra.mxu0 %v706_v1  ;;  %639 = vmatpush3.bf16.msra.mxu1 %v714_v4  ;;  %v711_v9 = vld [vmem:[%s1045_s1 + $0x28] sm:$0xff]   ;;  %v717_v10 = vld [vmem:[#allocation5 + $0x18] sm:$0xff]   ;;  %v712_v11 = vld [vmem:[%s1045_s1 + $0x30] sm:$0xff]  }
  0x3a   :  { %620 = vmatprep.subr.bf16.mxu0 %v837_v0  ;;  %640 = vmatprep.subr.bf16.mxu1 %v837_v0  ;;  %v718_v12 = vld [vmem:[#allocation5 + $0x20] sm:$0xff]   ;;  %v713_v13 = vld [vmem:[%s1045_s1 + $0x38] sm:$0xff]   ;;  %v73_v14 = vld [vmem:[#allocation2] sm:$0xff] }
  0x3b   :  { %v719_v15 = vld [vmem:[#allocation5 + $0x28] sm:$0xff]   ;;  %v74_v16 = vpack.c.bf16 %v73_v14, %v73_v14  ;;  %v720_v17 = vld [vmem:[#allocation5 + $0x30] sm:$0xff]   ;;  %v721_v18 = vld [vmem:[#allocation5 + $0x38] sm:$0xff]  }
  0x3c   :  { %v722_v19 = vld [vmem:[#allocation7] sm:$0xff]   ;;  %v723_v20 = vld [vmem:[#allocation7 + $0x8] sm:$0xff]   ;;  %v724_v21 = vld [vmem:[#allocation7 + $0x10] sm:$0xff]  }
  0x3d   :  { %621 = vmatpush3.bf16.msra.mxu0 %v707_v2  ;;  %641 = vmatpush3.bf16.msra.mxu1 %v715_v6  ;;  %v725_v22 = vld [vmem:[#allocation7 + $0x18] sm:$0xff]   ;;  %v726_v23 = vld [vmem:[#allocation7 + $0x20] sm:$0xff]   ;;  %v727_v24 = vld [vmem:[#allocation7 + $0x28] sm:$0xff]  }
  0x3e   :  { %622 = vmatprep.subr.bf16.mxu0 %v837_v0  ;;  %642 = vmatprep.subr.bf16.mxu1 %v837_v0  ;;  %v546_v25 = vld [vmem:[%s1046_s2] ss:$0 sm:$0xff]  ;;  %v728_v34 = vld [vmem:[#allocation7 + $0x30] sm:$0xff]   ;;  %v731_v37 = vld [vmem:[%s1051_s7 + $0x8] sm:$0xff]  }
  0x3f   :  { %v729_v35 = vld [vmem:[#allocation7 + $0x38] sm:$0xff]   ;;  %v732_v38 = vld [vmem:[%s1051_s7 + $0x10] sm:$0xff]   ;;  %v733_v39 = vld [vmem:[%s1051_s7 + $0x18] sm:$0xff]  }
  0x40   :  { %v730_v36 = vld [vmem:[%s1051_s7] sm:$0xff]   ;;  %v735_v41 = vld [vmem:[%s1051_s7 + $0x28] sm:$0xff]   ;;  %v736_v51 = vld [vmem:[%s1051_s7 + $0x30] sm:$0xff]  }
  0x41   :  { %623 = vmatpush3.bf16.msra.mxu0 %v708_v3  ;;  %643 = vmatpush3.bf16.msra.mxu1 %v716_v8  ;;  %v734_v40 = vld [vmem:[%s1051_s7 + $0x20] sm:$0xff]   ;;  %v737_v52 = vld [vmem:[%s1051_s7 + $0x38] sm:$0xff]   ;;  %s536_s7 = sshll.u32 %s839_s14, 4  ;;  %s537_s7 = int_to_ptr.vmem [resolvable:$true] %s536_s7 }
  0x42   :  { %624 = vmatprep.subr.bf16.mxu0 %v837_v0  ;;  %644 = vmatprep.subr.bf16.mxu1 %v837_v0  ;;  %v555_v42 = vld [vmem:[%s1048_s4] ss:$0 sm:$0xff]  ;;  %p809_p11 = scmp.lt.s32.totalorder %s537_s7, %s537_s7 }
  0x43   :  { %v564_v53 = vld [vmem:[%s1050_s6] ss:$0 sm:$0xff]  ;;  %s804_s6 = scalar_lea.vmem %s537_s7, 128 }
  0x44   :  { %v573_v62 = vld [vmem:[%s1052_s8] ss:$0 sm:$0xff]  ;;  %p805_p10 = scmp.ne.s32.totalorder %s537_s7, %s804_s6  ;;  %p810_p12 = scmp.lt.s32.totalorder %s804_s6, %s804_s6 }
  0x45   :  { %625 = vmatpush3.bf16.msra.mxu0 %v709_v5  ;;  %645 = vmatpush3.bf16.msra.mxu1 %v717_v10 }
  0x46   :  { %626 = vmatprep.subr.bf16.mxu0 %v837_v0  ;;  %646 = vmatprep.subr.bf16.mxu1 %v837_v0  ;;  %p811_p13 = por %p810_p12, %p809_p11 }
  0x48   :  { %p812_p0 = pnand %p811_p13, %p805_p10 }
  0x49   :  { %627 = vmatpush3.bf16.msra.mxu0 %v710_v7  ;;  %647 = vmatpush3.bf16.msra.mxu1 %v718_v12 }
  0x4a   :  { %628 = vmatprep.subr.bf16.mxu0 %v837_v0  ;;  %648 = vmatprep.subr.bf16.mxu1 %v837_v0 }
  0x4d   :  { %629 = vmatpush3.bf16.msra.mxu0 %v711_v9  ;;  %649 = vmatpush3.bf16.msra.mxu1 %v719_v15 }
  0x4e   :  { %630 = vmatprep.subr.bf16.mxu0 %v837_v0  ;;  %650 = vmatprep.subr.bf16.mxu1 %v837_v0 }
  0x51   :  { %631 = vmatpush3.bf16.msra.mxu0 %v712_v11  ;;  %651 = vmatpush3.bf16.msra.mxu1 %v720_v17 }
  0x52   :  { %632 = vmatprep.subr.bf16.mxu0 %v837_v0  ;;  %652 = vmatprep.subr.bf16.mxu1 %v837_v0 }
  0x55   :  { %633 = vmatpush3.bf16.msra.mxu0 %v713_v13  ;;  %653 = vmatpush3.bf16.msra.mxu1 %v721_v18 }
  0x56   :  { %658 = vmatprep.subr.bf16.mxu0 %v837_v0  ;;  %678 = vmatprep.subr.bf16.mxu1 %v837_v0 }
  0x58   :  { %635 = vmatmul.mubr.bf16.vlgmr.msra.gmra.mrb[0].mxu0 %v74_v16 }
  0x59   :  { %674 = vmatprep.mubr.msk.bf16.mxu0 %vm838_vm0, %v837_v0  ;;  %659 = vmatpush3.bf16.msra.mxu0 %v722_v19 }
  0x5a   :  { %660 = vmatprep.subr.bf16.mxu0 %v837_v0 }
  0x5d   :  { %661 = vmatpush3.bf16.msra.mxu0 %v723_v20 }
  0x5e   :  { %662 = vmatprep.subr.bf16.mxu0 %v837_v0 }
  0x61   :  { %663 = vmatpush3.bf16.msra.mxu0 %v724_v21 }
  0x62   :  { %664 = vmatprep.subr.bf16.mxu0 %v837_v0 }
  0x65   :  { %665 = vmatpush3.bf16.msra.mxu0 %v725_v22 }
  0x66   :  { %666 = vmatprep.subr.bf16.mxu0 %v837_v0 }
  0x69   :  { %667 = vmatpush3.bf16.msra.mxu0 %v726_v23 }
  0x6a   :  { %668 = vmatprep.subr.bf16.mxu0 %v837_v0 }
  0x6d   :  { %669 = vmatpush3.bf16.msra.mxu0 %v727_v24 }
  0x6e   :  { %670 = vmatprep.subr.bf16.mxu0 %v837_v0 }
  0x71   :  { %671 = vmatpush3.bf16.msra.mxu0 %v728_v34 }
  0x72   :  { %672 = vmatprep.subr.bf16.mxu0 %v837_v0 }
  0x75   :  { %673 = vmatpush3.bf16.msra.mxu0 %v729_v35 }
 0x12b   :  { %v180_v26 = vpop.f32.mrb[0].mxu0 }
 0x12c   :  { %v181_v27 = vadd.f32 %v546_v25, %v180_v26  ;;  %v636_v28 = vpop.f32.mrb[1].mxu0 }
 0x12d   :  { %v183_v29 = vpop.f32.mrb[2].mxu0 }
 0x12e   :  { %v186_v30 = vmul.f32 0.2, %v181_v27  ;;  %v637_v31 = vpop.f32.mrb[3].mxu0 }
 0x130   :  { %v187_v32 = vmax.f32 %v181_v27, %v186_v30 }
 0x132   :  { %v188_v33 = vpack.c.bf16 %v187_v32, %v187_v32 }
 0x134   :  { %655 = vmatmul.mubr.bf16.vlgmr.msra.gmra.mrb[0].mxu1 %v188_v33 }
 0x135   :  { %694 = vmatprep.mubr.msk.bf16.mxu1 %vm838_vm0, %v837_v0  ;;  %679 = vmatpush3.bf16.msra.mxu1 %v730_v36 }
 0x136   :  { %680 = vmatprep.subr.bf16.mxu1 %v837_v0 }
 0x139   :  { %681 = vmatpush3.bf16.msra.mxu1 %v731_v37 }
 0x13a   :  { %682 = vmatprep.subr.bf16.mxu1 %v837_v0 }
 0x13d   :  { %683 = vmatpush3.bf16.msra.mxu1 %v732_v38 }
 0x13e   :  { %684 = vmatprep.subr.bf16.mxu1 %v837_v0 }
 0x141   :  { %685 = vmatpush3.bf16.msra.mxu1 %v733_v39 }
 0x142   :  { %686 = vmatprep.subr.bf16.mxu1 %v837_v0 }
 0x145   :  { %687 = vmatpush3.bf16.msra.mxu1 %v734_v40 }
 0x146   :  { %688 = vmatprep.subr.bf16.mxu1 %v837_v0 }
 0x149   :  { %689 = vmatpush3.bf16.msra.mxu1 %v735_v41 }
 0x14a   :  { %690 = vmatprep.subr.bf16.mxu1 %v837_v0 }
 0x14d   :  { %691 = vmatpush3.bf16.msra.mxu1 %v736_v51 }
 0x14e   :  { %692 = vmatprep.subr.bf16.mxu1 %v837_v0 }
 0x151   :  { %693 = vmatpush3.bf16.msra.mxu1 %v737_v52 }
 0x207   :  { %v294_v43 = vpop.f32.mrb[0].mxu1 }
 0x208   :  { %v295_v44 = vadd.f32 %v555_v42, %v294_v43  ;;  %v656_v45 = vpop.f32.mrb[1].mxu1 }
 0x209   :  { %v297_v46 = vpop.f32.mrb[2].mxu1 }
 0x20a   :  { %v300_v47 = vmul.f32 0.2, %v295_v44  ;;  %v657_v48 = vpop.f32.mrb[3].mxu1 }
 0x20c   :  { %v301_v49 = vmax.f32 %v295_v44, %v300_v47 }
 0x20e   :  { %v302_v50 = vpack.c.bf16 %v301_v49, %v301_v49 }
 0x210   :  { %675 = vmatmul.mubr.bf16.vlgmr.msra.gmra.mrb[4].mxu0 %v302_v50 }
 0x2e3   :  { %v408_v54 = vpop.f32.mrb[4].mxu0 }
 0x2e4   :  { %v409_v55 = vadd.f32 %v564_v53, %v408_v54  ;;  %v676_v56 = vpop.f32.mrb[5].mxu0 }
 0x2e5   :  { %v411_v57 = vpop.f32.mrb[6].mxu0 }
 0x2e6   :  { %v414_v58 = vmul.f32 0.2, %v409_v55  ;;  %v677_v59 = vpop.f32.mrb[7].mxu0 }
 0x2e8   :  { %v415_v60 = vmax.f32 %v409_v55, %v414_v58 }
 0x2ea   :  { %v416_v61 = vpack.c.bf16 %v415_v60, %v415_v60 }
 0x2ec   :  { %695 = vmatmul.mubr.bf16.vlgmr.msra.gmra.mrb[4].mxu1 %v416_v61 }
 0x3bf   :  { %v522_v63 = vpop.f32.mrb[4].mxu1 }
 0x3c0   :  { %v523_v0 = vadd.f32 %v573_v62, %v522_v63  ;;  %v696_v1 = vpop.f32.mrb[5].mxu1 }
 0x3c1   :  { %v525_v2 = vpop.f32.mrb[6].mxu1 }
 0x3c2   :  { %v697_v3 = vpop.f32.mrb[7].mxu1  ;;  %529 = vst.msk [vmem:[#allocation8] sm:$0xff] %vm528_vm1, %v523_v0 }
 0x3c3   :  { %815 = shalt.err (!%p812_p0)
}
 0x3c4   :  { %s816_s8 = scalar_lea.hbm %s1053_s9, 128 }
 0x3c5   :  { %p817_p1 = scmp.ne.s32.totalorder %s1053_s9, %s816_s8  ;;  %p820_p2 = scmp.lt.u32.totalorder %s816_s8, %s1053_s9 }
 0x3c7   :  { %p822_p3 = pnand %p820_p2, %p817_p1 }
 0x3c9   :  { %825 = shalt.err (!%p822_p3)
}
 0x3ca   :  { %539 = dma.vmem_to_hbm [thread:$0]  %s537_s7, 128, %s1053_s9, [#allocation4]  }
 0x3cb   :  { %830 = dma.done.wait [#allocation4], 128  }
 0x3cc   :  { %831 = vsyncadd [#allocation4], 4294967168 }
 0x3cd   :  { %543 = vsyncpa [#allocation3], 1 }
 0x3ce   :  { %544 = vsyncpa [#allocation6], 1 }
 0x3cf   :  { %545 = vsyncpa [#allocation4], 1 }

</bundles_post_ra>
